<compile_context>
chip_gen: v7x
topology: tpu7x:2x2x1
jax: 0.10.0
libtpu: 0.0.40
codegen_flags: <defaults>
</compile_context>

<pallas_src>
import functools

import jax
import jax.numpy as jnp
from jax.experimental import pallas as pl
from jax.experimental.pallas import tpu as pltpu


def highway_kernel(x_ref, wc_ref, bc_ref, o_ref):
    x = x_ref[...]
    x_f32 = x.astype(jnp.float32)

    # Fused W1||W2 projection: bf16 MXU matmul with f32 accumulation.
    y12 = jnp.dot(
        x.astype(jnp.bfloat16),
        wc_ref[...],
        preferred_element_type=jnp.float32,
    ) + bc_ref[...]

    half = wc_ref.shape[1] // 2          # static slice boundary
    x1 = y12[:, :half]
    x2 = y12[:, half:]

    # sigmoid(x2) = 1 / (1 + exp(-x2)): exp on EUP, approx reciprocal (cheap).
    g = pl.reciprocal(1.0 + jnp.exp(-x2), approx=True)

    # y = g*relu(x1) + (1-g)*x  ==  x + g*(relu(x1) - x)
    y = x_f32 + g * (jnp.maximum(x1, 0.0) - x_f32)
    o_ref[...] = y.astype(o_ref.dtype)


def _choose_tm(n, tile_m):
    """Row tile: multiple of 8 (or == n), big enough to amortize per-step
    overhead, small enough to give >=4 tiles on moderate N (v7x dual-TC)."""
    if n <= 8:
        return n
    tm = min(tile_m, n)
    tm = max(8, (tm // 8) * 8)
    if n >= 64:
        cap = max(8, (n // 4) // 8 * 8)   # ensure cdiv(n, tm) >= 4
        tm = min(tm, cap)
    return tm


def prepare_highway_params(w1, b1, w2, b2):
    """One-time parameter prep (NOT on the per-call hot path).

    w1/w2: (size, size) in PyTorch nn.Linear layout (out, in); b1/b2: (size,).
    Returns fused (size, 2*size) bf16 weight and (1, 2*size) f32 bias.
    """
    size = w1.shape[0]
    wc = jnp.concatenate([w1.T, w2.T], axis=1).astype(jnp.bfloat16)
    bc = jnp.concatenate([b1, b2]).reshape(1, 2 * size).astype(jnp.float32)
    return wc, bc


@functools.partial(jax.jit, static_argnames=("tile_m",))
def highway_forward(x, wc, bc, *, tile_m=1024):
    """x: (..., size). wc: (size, 2*size) bf16. bc: (1, 2*size) f32."""
    size = x.shape[-1]
    lead_shape = x.shape[:-1]
    x2d = x.reshape(-1, size)
    n = x2d.shape[0]

    tm = _choose_tm(n, tile_m)
    grid = (pl.cdiv(n, tm),)

    itemsize = x2d.dtype.itemsize
    # Explicit VMEM budget: double-buffered in/out tiles + resident weights +
    # f32 temporaries, with 2x headroom, clamped to [16 MiB, 64 MiB] (v7x cap).
    vmem_est = (
        2 * tm * size * itemsize          # x tiles (double-buffered)
        + 2 * tm * size * itemsize        # out tiles (double-buffered)
        + 2 * size * (2 * size) * 2       # fused bf16 weights
        + 2 * (2 * size) * 4              # bias
        + 3 * tm * (2 * size) * 4         # y12 / g / blend f32 temporaries
    )
    vmem_limit = int(min(max(2 * vmem_est, 16 * 1024 * 1024), 64 * 1024 * 1024))

    cost = pl.CostEstimate(
        flops=2 * n * size * (2 * size),
        transcendentals=n * size,
        bytes_accessed=2 * n * size * itemsize
        + wc.size * wc.dtype.itemsize
        + bc.size * bc.dtype.itemsize,
    )

    out = pl.pallas_call(
        highway_kernel,
        out_shape=jax.ShapeDtypeStruct((n, size), x.dtype),
        grid_spec=pltpu.PrefetchScalarGridSpec(
            num_scalar_prefetch=0,
            grid=grid,
            in_specs=[
                pl.BlockSpec((tm, size), lambda i: (i, 0)),          # x tile (pipelined)
                pl.BlockSpec((size, 2 * size), lambda i: (0, 0)),    # Wc (resident)
                pl.BlockSpec((1, 2 * size), lambda i: (0, 0)),       # bias (resident)
            ],
            out_specs=pl.BlockSpec((tm, size), lambda i: (i, 0)),
        ),
        compiler_params=pltpu.CompilerParams(
            dimension_semantics=("parallel",),   # v7x: shard row tiles over 2 TCs
            vmem_limit_bytes=vmem_limit,
        ),
        cost_estimate=cost,
    )(x2d, wc, bc)

    return out.reshape(*lead_shape, size)


if __name__ == "__main__":
    size = 32     # highway feature size
    batch = 2
    seq = 8

    key = jax.random.PRNGKey(0)
    k_x, k_w1, k_w2, k_b2 = jax.random.split(key, 4)

    # Deterministic parameter init (shapes follow nn.Linear(size, size)).
    x = jax.random.normal(k_x, (batch, seq, size), dtype=jnp.float32)
    w1 = jax.random.normal(k_w1, (size, size), dtype=jnp.float32) * 0.1
    b1 = jnp.zeros((size,), dtype=jnp.float32)          # W1.bias.data.fill_(0.0)
    w2 = jax.random.normal(k_w2, (size, size), dtype=jnp.float32) * 0.1
    b2 = jax.random.normal(k_b2, (size,), dtype=jnp.float32) * 0.1

    # One-time weight prep (off the hot path), then the kernel call.
    wc, bc = prepare_highway_params(w1, b1, w2, b2)
    y = highway_forward(x, wc, bc)
    y = jax.block_until_ready(y)

    # Reference check in plain JAX (same math as the PyTorch module).
    # Tolerance covers the bf16 MXU inputs and the approx reciprocal.
    x1_ref = x @ w1.T + b1
    x2_ref = x @ w2.T + b2
    g_ref = jax.nn.sigmoid(x2_ref)
    y_ref = g_ref * jnp.maximum(x1_ref, 0.0) + (1.0 - g_ref) * x
    assert jnp.allclose(y, y_ref, atol=3e-2, rtol=3e-2), "mismatch vs reference"

    print("KERNEL_OK")
</pallas_src>

<mosaic_0001>
module attributes {stable_mosaic.version = 11 : i64} {
  func.func @highway_kernel(%arg0: i32, %arg1: memref<16x32xf32, #tpu.memory_space<vmem>>, %arg2: memref<32x64xbf16, #tpu.memory_space<vmem>>, %arg3: memref<1x64xf32, #tpu.memory_space<vmem>>, %arg4: memref<16x32xf32, #tpu.memory_space<vmem>>) attributes {dimension_semantics = [#tpu.dimension_semantics<parallel>], iteration_bounds = array<i64: 1>, scalar_prefetch = 0 : i64, scratch_operands = 0 : i64, tpu.core_type = #tpu.core_type<tc>, window_params = [{transform_indices = @transform_0, window_bounds = array<i64: 16, 32>}, {pipeline_mode = #tpu.pipeline_mode<synchronous>, transform_indices = @transform_1, window_bounds = array<i64: 32, 64>}, {pipeline_mode = #tpu.pipeline_mode<synchronous>, transform_indices = @transform_2, window_bounds = array<i64: 1, 64>}, {transform_indices = @transform_3, window_bounds = array<i64: 16, 32>}]} {
    %c0 = arith.constant 0 : index
    %c0_0 = arith.constant 0 : index
    %0 = vector.load %arg1[%c0, %c0_0] : memref<16x32xf32, #tpu.memory_space<vmem>>, vector<16x32xf32>
    %1 = arith.truncf %0 : vector<16x32xf32> to vector<16x32xbf16>
    %c0_1 = arith.constant 0 : index
    %c0_2 = arith.constant 0 : index
    %2 = vector.load %arg2[%c0_1, %c0_2] : memref<32x64xbf16, #tpu.memory_space<vmem>>, vector<32x64xbf16>
    %cst = arith.constant dense<0.000000e+00> : vector<16x64xf32>
    %3 = tpu.matmul %1, %2, %cst {dimension_numbers = #tpu.dot_dimension_numbers<[1], [0], [0], [1], [0, 0, 1, 1], [], []>} : vector<16x32xbf16>, vector<32x64xbf16>, vector<16x64xf32> -> vector<16x64xf32>
    %c0_3 = arith.constant 0 : index
    %c0_4 = arith.constant 0 : index
    %4 = vector.load %arg3[%c0_3, %c0_4] : memref<1x64xf32, #tpu.memory_space<vmem>>, vector<1x64xf32>
    %5 = vector.broadcast %4 : vector<1x64xf32> to vector<16x64xf32>
    %6 = arith.addf %3, %5 : vector<16x64xf32>
    %7 = vector.extract_strided_slice %6 {offsets = [0, 0], sizes = [16, 32], strides = [1, 1]} : vector<16x64xf32> to vector<16x32xf32>
    %8 = vector.extract_strided_slice %6 {offsets = [0, 32], sizes = [16, 32], strides = [1, 1]} : vector<16x64xf32> to vector<16x32xf32>
    %cst_5 = arith.constant 0.000000e+00 : f32
    %9 = vector.broadcast %cst_5 : f32 to vector<16x32xf32>
    %10 = arith.subf %9, %8 : vector<16x32xf32>
    %11 = math.exp %10 : vector<16x32xf32>
    %cst_6 = arith.constant 1.000000e+00 : f32
    %12 = vector.broadcast %cst_6 : f32 to vector<16x32xf32>
    %13 = arith.addf %12, %11 : vector<16x32xf32>
    %14 = tpu.reciprocal %13 {approx = true} : vector<16x32xf32> -> vector<16x32xf32>
    %cst_7 = arith.constant 0.000000e+00 : f32
    %15 = vector.broadcast %cst_7 : f32 to vector<16x32xf32>
    %16 = arith.maximumf %7, %15 : vector<16x32xf32>
    %17 = arith.subf %16, %0 : vector<16x32xf32>
    %18 = arith.mulf %14, %17 : vector<16x32xf32>
    %19 = arith.addf %0, %18 : vector<16x32xf32>
    %c0_8 = arith.constant 0 : index
    %c0_9 = arith.constant 0 : index
    %20 = vector.load %arg4[%c0_8, %c0_9] : memref<16x32xf32, #tpu.memory_space<vmem>>, vector<16x32xf32>
    tpu.vector_store %arg4[%c0_8, %c0_9], %19 {strides = array<i32>} : memref<16x32xf32, #tpu.memory_space<vmem>>, vector<16x32xf32>,
    return
  }
  func.func @transform_0(%arg0: i32) -> (i32, i32) {
    %c0_i32 = arith.constant 0 : i32
    %c0_i32_0 = arith.constant 0 : i32
    return %arg0, %c0_i32 : i32, i32
  }
  func.func @transform_1(%arg0: i32) -> (i32, i32) {
    %c0_i32 = arith.constant 0 : i32
    %c0_i32_0 = arith.constant 0 : i32
    %c0_i32_1 = arith.constant 0 : i32
    return %c0_i32, %c0_i32_0 : i32, i32
  }
  func.func @transform_2(%arg0: i32) -> (i32, i32) {
    %c0_i32 = arith.constant 0 : i32
    %c0_i32_0 = arith.constant 0 : i32
    %c0_i32_1 = arith.constant 0 : i32
    return %c0_i32, %c0_i32_0 : i32, i32
  }
  func.func @transform_3(%arg0: i32) -> (i32, i32) {
    %c0_i32 = arith.constant 0 : i32
    %c0_i32_0 = arith.constant 0 : i32
    return %arg0, %c0_i32 : i32, i32
  }
}

</mosaic_0001>

<bundles_post_ra>
// kernel: highway_forward.1
= control target key start
LH: loop header
LB: loop body
LE: loop exit
PB: predicated region body
PF: predicated region fallthrough
CT: control target
= control target key end

     0   :  { %8 = vsyncpa [#allocation3], 0  ;;  %s356_s0 = inlined_call_operand.hbm [shape: f32[16,32], index: 0, kind: input, shape index: {}]   ;;  %s357_s1 = inlined_call_operand.hbm [shape: bf16[32,64], index: 1, kind: input, shape index: {}]   ;;  %s358_s2 = inlined_call_operand.vmem [shape: f32[1,64], index: 2, kind: input, shape index: {}]   ;;  %s359_s3 = inlined_call_operand.hbm [shape: f32[16,32], index: 3, kind: output, shape index: {}]  }
   0x1   :  { %9 = vsyncpa [#allocation6], 0 }
   0x2   :  { %10 = vsyncpa [#allocation4], 0  ;;  %s277_s12 = smov [#allocation2]   ;;  %s205_s16 = scalar_lea.hbm %s356_s0, 256 }
   0x3   :  { %s16_s13 = sshll.u32 %s277_s12, 4  ;;  %p206_p0 = scmp.ne.s32.totalorder %s356_s0, %s205_s16  ;;  %s17_s13 = int_to_ptr.vmem [resolvable:$true] %s16_s13 }
   0x4   :  { %p209_p1 = scmp.lt.u32.totalorder %s205_s16, %s356_s0 }
   0x6   :  { %p211_p2 = pnand %p209_p1, %p206_p0 }
   0x8   :  { %214 = shalt.err (!%p211_p2)
}
   0x9   :  { %s215_s21 = scalar_lea.vmem %s17_s13, 256  ;;  %p220_p4 = scmp.lt.s32.totalorder %s17_s13, %s17_s13 }
   0xa   :  { %p216_p3 = scmp.ne.s32.totalorder %s17_s13, %s215_s21  ;;  %p221_p5 = scmp.lt.s32.totalorder %s215_s21, %s215_s21 }
   0xc   :  { %p222_p6 = por %p221_p5, %p220_p4 }
   0xe   :  { %p223_p7 = pnand %p222_p6, %p216_p3 }
  0x10   :  { %226 = shalt.err (!%p223_p7)
}
  0x11   :  { %s278_s22 = smov 128   ;;  %s279_s23 = smov 8  }
  0x12   :  { %22 = dma.hbm_to_vmem [thread:$0]  %s356_s0, 256, %s17_s13, [#allocation3], %s278_s22, %s278_s22, %s279_s23  }
  0x13   :  { %s280_s26 = smov [#allocation5]   ;;  %s227_s30 = scalar_lea.hbm %s357_s1, 256 }
  0x14   :  { %s28_s27 = sshll.u32 %s280_s26, 4  ;;  %p228_p8 = scmp.ne.s32.totalorder %s357_s1, %s227_s30  ;;  %s29_s27 = int_to_ptr.vmem [resolvable:$true] %s28_s27 }
  0x15   :  { %p231_p9 = scmp.lt.u32.totalorder %s227_s30, %s357_s1 }
  0x17   :  { %p233_p10 = pnand %p231_p9, %p228_p8 }
  0x19   :  { %236 = shalt.err (!%p233_p10)
}
  0x1a   :  { %s237_s8 = scalar_lea.vmem %s29_s27, 256  ;;  %p242_p12 = scmp.lt.s32.totalorder %s29_s27, %s29_s27 }
  0x1b   :  { %p238_p11 = scmp.ne.s32.totalorder %s29_s27, %s237_s8  ;;  %p243_p13 = scmp.lt.s32.totalorder %s237_s8, %s237_s8 }
  0x1d   :  { %p244_p0 = por %p243_p13, %p242_p12 }
  0x1f   :  { %p245_p1 = pnand %p244_p0, %p238_p11 }
  0x21   :  { %248 = shalt.err (!%p245_p1)
}
  0x22   :  { %s281_s0 = smov 64   ;;  %s282_s9 = smov 4  }
  0x23   :  { %34 = dma.hbm_to_vmem [thread:$0]  %s357_s1, 256, %s29_s27, [#allocation6], %s281_s0, %s281_s0, %s282_s9  }
  0x24   :  { %271 = dma.done.wait [#allocation3], 256  }
  0x25   :  { %272 = vsyncadd [#allocation3], 4294967040 }
  0x26   :  { %273 = dma.done.wait [#allocation6], 256  }
  0x27   :  { %274 = vsyncadd [#allocation6], 4294967040  ;;  %v283_v0 = vmov 0.0   ;;  %vm284_vm0 = vmmov 0   ;;  %v195_v1 = vld [vmem:[#allocation5] sm:$0xff]   ;;  %v196_v2 = vld [vmem:[#allocation5 + $0x8] sm:$0xff]  }
  0x28   :  { %176 = vmatprep.subr.bf16.mxu0 %v283_v0  ;;  %180 = vmatprep.mubr.msk.bf16.mxu0 %vm284_vm0, %v283_v0  ;;  %v44_v3 = vld [vmem:[#allocation2] sm:$0xff]  ;;  %v45_v4 = vld [vmem:[#allocation2 + $0x8] sm:$0xff]  ;;  %vm70_vm1 = vcmask 261120   ;;  %s285_s13 = smov 32   ;;  %s287_s14 = smov [#allocation7]  }
  0x29   :  { %177 = vmatpush3.bf16.msra.mxu0 %v195_v1  ;;  %v46_v5 = vpack.c.bf16 %v45_v4, %v44_v3  ;;  %v169_v6 = vld [vmem:[%s358_s2] ss:$0 sm:$0xff]  ;;  %s286_s2 = smov 96   ;;  %s156_s15 = sshll.u32 %s287_s14, 4  ;;  %s157_s15 = int_to_ptr.vmem [resolvable:$true] %s156_s15 }
  0x2a   :  { %178 = vmatprep.subr.bf16.mxu0 %v283_v0  ;;  %s249_s16 = scalar_lea.vmem %s157_s15, 256  ;;  %p254_p3 = scmp.lt.s32.totalorder %s157_s15, %s157_s15 }
  0x2b   :  { %p250_p2 = scmp.ne.s32.totalorder %s157_s15, %s249_s16  ;;  %p255_p4 = scmp.lt.s32.totalorder %s249_s16, %s249_s16 }
  0x2d   :  { %179 = vmatpush3.bf16.msra.mxu0 %v196_v2  ;;  %p256_p5 = por %p255_p4, %p254_p3 }
  0x2f   :  { %p257_p6 = pnand %p256_p5, %p250_p2 }
  0x30   :  { %181 = vmatmul.mubr.msk.bf16.vlgmr.msra.gmra.mrb[0].mxu0 %vm70_vm1, %v46_v5 }
 0x103   :  { %v108_v7 = vpop.f32.mrb[0].mxu0 }
 0x104   :  { %v109_v8 = vadd.f32 %v169_v6, %v108_v7  ;;  %v182_v9 = vpop.f32.mrb[1].mxu0 }
 0x105   :  { %v111_v10 = vpop.f32.mrb[2].mxu0 }
 0x106   :  { %v125_v11 = vmax.f32 %v109_v8, 0.0  ;;  %v112_v12 = vadd.f32 %v169_v6, %v111_v10  ;;  %v183_v13 = vpop.f32.mrb[3].mxu0  ;;  %v115_v17 = vsub.f32 0.0, %v109_v8 }
 0x108   :  { %v126_v14 = vmax.f32 %v112_v12, 0.0  ;;  %v127_v15 = vsub.f32 %v125_v11, %v44_v3  ;;  %v117_v18 = vmul.f32 1.442695, %v115_v17  ;;  %v116_v19 = vsub.f32 0.0, %v112_v12 }
 0x10a   :  { %131 = vrot.lane.b32.xlu0 %v127_v15, %s285_s13  ;;  %v128_v16 = vsub.f32 %v126_v14, %v45_v4  ;;  %197 = vpow2.f32 %v117_v18  ;;  %v119_v20 = vmul.f32 1.442695, %v116_v19 }
 0x10c   :  { %199 = vpow2.f32 %v119_v20 }
 0x10e   :  { %133 = vrot.lane.b32.xlu0 %v128_v16, %s285_s13 }
 0x114   :  { %v198_v21 = vpop.eup %197 }
 0x115   :  { %v121_v22 = vadd.f32 1.0, %v198_v21 }
 0x116   :  { %v200_v23 = vpop.eup %199 }
 0x117   :  { %201 = vrcp.f32 %v121_v22  ;;  %v122_v24 = vadd.f32 1.0, %v200_v23 }
 0x119   :  { %203 = vrcp.f32 %v122_v24 }
 0x121   :  { %v202_v25 = vpop.eup %201 }
 0x123   :  { %v204_v28 = vpop.eup %203 }
 0x17c   :  { %v132_v26 = vpop.permute.xlu0 %131 }
 0x17d   :  { %v137_v27 = vmul.f32 %v202_v25, %v132_v26 }
 0x17f   :  { %141 = vrot.lane.b32.xlu1 %v137_v27, %s286_s2 }
 0x180   :  { %v134_v29 = vpop.permute.xlu0 %133 }
 0x181   :  { %v138_v30 = vmul.f32 %v204_v28, %v134_v29 }
 0x183   :  { %143 = vrot.lane.b32.xlu1 %v138_v30, %s286_s2 }
 0x1f1   :  { %v142_v31 = vpop.permute.xlu1 %141 }
 0x1f2   :  { %v147_v32 = vadd.f32 %v142_v31, %v44_v3 }
 0x1f4   :  { %149 = vst.msk [vmem:[#allocation7] sm:$0xff] %vm70_vm1, %v147_v32 }
 0x1f5   :  { %v144_v33 = vpop.permute.xlu1 %143 }
 0x1f6   :  { %v148_v34 = vadd.f32 %v144_v33, %v45_v4 }
 0x1f8   :  { %150 = vst.msk [vmem:[#allocation7 + $0x8] sm:$0xff] %vm70_vm1, %v148_v34 }
 0x1f9   :  { %260 = shalt.err (!%p257_p6)
}
 0x1fa   :  { %s261_s19 = scalar_lea.hbm %s359_s3, 256 }
 0x1fb   :  { %p262_p7 = scmp.ne.s32.totalorder %s359_s3, %s261_s19  ;;  %p265_p8 = scmp.lt.u32.totalorder %s261_s19, %s359_s3 }
 0x1fd   :  { %p267_p9 = pnand %p265_p8, %p262_p7 }
 0x1ff   :  { %270 = shalt.err (!%p267_p9)
}
 0x200   :  { %162 = dma.vmem_to_hbm [thread:$0]  %s157_s15, 256, %s359_s3, [#allocation4], %s278_s22, %s278_s22, %s279_s23  }
 0x201   :  { %275 = dma.done.wait [#allocation4], 256  }
 0x202   :  { %276 = vsyncadd [#allocation4], 4294967040 }
 0x203   :  { %166 = vsyncpa [#allocation3], 1 }
 0x204   :  { %167 = vsyncpa [#allocation6], 1 }
 0x205   :  { %168 = vsyncpa [#allocation4], 1 }

</bundles_post_ra>
